<compile_context>
chip_gen: v5e
topology: v5e:2x2
jax: 0.10.0
libtpu: 0.0.40
codegen_flags: <defaults>
</compile_context>

<pallas_src>
import functools
import math

import jax
import jax.numpy as jnp
from jax.experimental import pallas as pl
from jax.experimental.pallas import tpu as pltpu

LANES = 128
SUBS = 8                       # sublanes of one f32 vreg
ROW_BLOCK = SUBS * LANES       # 1024-element alignment of the flattened row
MAX_TILE_R = 2048              # rows per grid step -> 1 MiB per input per step (f32)


def _cls_loss_kernel(pw_ref, preds_ref, labels_ref, out_ref, *,
                     rem_elems, need_mask):
    """Accumulate per-batch BCE-with-logits / dice-numerator / dice-denominator sums.

    pw_ref     : SMEM f32[1]                  pos_weight scalar
    preds_ref  : VMEM [1, tile_r, 128]        logits tile of batch b (native dtype)
    labels_ref : VMEM [1, tile_r, 128]        labels tile of batch b (native dtype)
    out_ref    : VMEM f32[1, 24, 128]         rows 0:8 bce-sum, 8:16 dice-num, 16:24 dice-den
    """
    t = pl.program_id(1)
    n_t = pl.num_programs(1)

    @pl.when(t == 0)
    def _init():
        out_ref[...] = jnp.zeros_like(out_ref)

    pw = pw_ref[0]
    x = preds_ref[0].astype(jnp.float32)
    y = labels_ref[0].astype(jnp.float32)
    tile_r = x.shape[0]

    # Two EUP ops per element (exp, log); sigmoid comes from a reciprocal.
    e = jnp.exp(-jnp.abs(x))                         # exp(-|x|) in (0, 1]
    sp = jnp.maximum(x, 0.0) + jnp.log(1.0 + e)      # softplus(x), numerically stable
    # softplus(-x) = softplus(x) - x
    bce = pw * y * (sp - x) + (1.0 - y) * sp
    r = pl.reciprocal(1.0 + e, approx=False)         # exact: keeps 1e-5 tolerance
    s = jnp.where(x >= 0.0, r, e * r)                # sigmoid(x) without a second exp
    num = s * y
    den = s + y

    def fold(v):  # (tile_r, 128) -> (8, 128) partial sums; pure VALU vreg adds
        return v.reshape(tile_r // SUBS, SUBS, LANES).sum(0)

    def accumulate(bce_v, num_v, den_v):
        out_ref[0, 0:SUBS, :] += fold(bce_v)
        out_ref[0, SUBS:2 * SUBS, :] += fold(num_v)
        out_ref[0, 2 * SUBS:3 * SUBS, :] += fold(den_v)

    if need_mask:
        # Padding zeros / garbage rows can only live in the last inner-grid tile.
        @pl.when(t < n_t - 1)
        def _full_tiles():
            accumulate(bce, num, den)

        @pl.when(t == n_t - 1)
        def _tail_tile():
            row = jax.lax.broadcasted_iota(jnp.int32, x.shape, 0)
            col = jax.lax.broadcasted_iota(jnp.int32, x.shape, 1)
            # rem_elems is a static Python int < tile_r*128, so no int32 overflow.
            valid = row * LANES + col < rem_elems
            # Select-based mask so Inf/NaN from garbage lanes cannot propagate.
            accumulate(jnp.where(valid, bce, 0.0),
                       jnp.where(valid, num, 0.0),
                       jnp.where(valid, den, 0.0))
    else:
        accumulate(bce, num, den)


@functools.partial(jax.jit, static_argnames=("lambda_value", "loss_type"))
def classification_loss(preds, labels, pos_weight, lambda_value=0.5,
                        loss_type="bce"):
    """Matches ClassificationLoss.forward (loss_type='bce')."""
    if loss_type != "bce":
        # TODO(synk): the original module's non-'bce' branch is `pass` (returns None);
        # only the 'bce' path is implemented.
        raise NotImplementedError("only loss_type='bce' is supported")

    B = preds.shape[0]
    N = math.prod(preds.shape[1:])

    # Lane-dense per-batch view (B, R, 128) with R a multiple of 8 sublanes.
    R = -(-N // ROW_BLOCK) * SUBS
    pad = R * LANES - N

    preds2 = preds.reshape(B, N)      # native dtype; upcast happens in-kernel
    labels2 = labels.reshape(B, N)
    if pad > 0:                       # <= 1023 elements per row, only when needed
        preds2 = jnp.pad(preds2, ((0, 0), (0, pad)))
        labels2 = jnp.pad(labels2, ((0, 0), (0, pad)))
    preds3 = preds2.reshape(B, R, LANES)
    labels3 = labels2.reshape(B, R, LANES)

    if R <= MAX_TILE_R:
        tile_r, n_tiles = R, 1        # single full-extent tile per batch row
    else:
        tile_r = MAX_TILE_R           # multiple of 8/16/32 -> any input dtype OK
        n_tiles = -(-R // tile_r)     # last tile may be partial (Pallas edge block)

    # Valid element count inside the last inner-grid tile (static Python int).
    rem_elems = N - (n_tiles - 1) * tile_r * LANES
    need_mask = rem_elems < tile_r * LANES

    pw = jnp.asarray(pos_weight, jnp.float32).reshape(-1)[:1]

    kernel = functools.partial(_cls_loss_kernel,
                               rem_elems=rem_elems, need_mask=need_mask)

    sums = pl.pallas_call(
        kernel,
        out_shape=jax.ShapeDtypeStruct((B, 3 * SUBS, LANES), jnp.float32),
        grid_spec=pltpu.PrefetchScalarGridSpec(
            num_scalar_prefetch=0,
            grid=(B, n_tiles),
            in_specs=[
                pl.BlockSpec(memory_space=pltpu.MemorySpace.SMEM),          # pos_weight
                pl.BlockSpec((1, tile_r, LANES), lambda b, t: (b, t, 0)),   # preds
                pl.BlockSpec((1, tile_r, LANES), lambda b, t: (b, t, 0)),   # labels
            ],
            out_specs=pl.BlockSpec((1, 3 * SUBS, LANES),
                                   lambda b, t: (b, 0, 0)),
        ),
        compiler_params=pltpu.CompilerParams(
            dimension_semantics=("parallel", "arbitrary")),
    )(pw, preds3, labels3)

    per_b = sums.reshape(B, 3, SUBS * LANES).sum(-1)      # (B, 3), tiny
    bce = jnp.sum(per_b[:, 0]) / (B * N)
    dice = jnp.mean(1.0 - 2.0 * per_b[:, 1] / per_b[:, 2])
    return lambda_value * bce + (1.0 - lambda_value) * dice


def _reference(preds, labels, pos_weight, lambda_value=0.5):
    """Pure-JAX reference mirroring the PyTorch module."""
    x = preds.astype(jnp.float32)
    y = labels.astype(jnp.float32)
    pw = jnp.asarray(pos_weight, jnp.float32).reshape(-1)[0]
    sp = jax.nn.softplus(x)
    bce = jnp.mean(pw * y * (sp - x) + (1.0 - y) * sp)
    s = jax.nn.sigmoid(x)
    B = x.shape[0]
    num = 2.0 * (s * y).reshape(B, -1).sum(-1)
    den = (s + y).reshape(B, -1).sum(-1)
    dice = jnp.mean(1.0 - num / den)
    return lambda_value * bce + (1.0 - lambda_value) * dice


if __name__ == "__main__":
    key = jax.random.PRNGKey(0)
    k1, k2 = jax.random.split(key)

    shape = (2, 4, 16, 16)  # (batch, channels, H, W)
    preds = jax.random.normal(k1, shape, dtype=jnp.float32)            # logits
    labels = (jax.random.uniform(k2, shape) > 0.5).astype(jnp.float32)
    pos_weight = jnp.array([2.0, 2.0], dtype=jnp.float32)              # module uses pos_weight[0]

    loss = classification_loss(preds, labels, pos_weight, lambda_value=0.5)
    jax.block_until_ready(loss)

    ref = _reference(preds, labels, pos_weight, lambda_value=0.5)
    assert jnp.allclose(loss, ref, rtol=1e-5, atol=1e-5), (loss, ref)

    print("KERNEL_OK")
</pallas_src>

<mosaic_0001>
module attributes {stable_mosaic.version = 11 : i64} {
  func.func @_cls_loss_kernel(%arg0: i32, %arg1: i32, %arg2: memref<1xf32, #tpu.memory_space<smem>>, %arg3: memref<1x8x128xf32, #tpu.memory_space<vmem>>, %arg4: memref<1x8x128xf32, #tpu.memory_space<vmem>>, %arg5: memref<1x24x128xf32, #tpu.memory_space<vmem>>) attributes {dimension_semantics = [#tpu.dimension_semantics<parallel>, #tpu.dimension_semantics<arbitrary>], iteration_bounds = array<i64: 2, 1>, scalar_prefetch = 0 : i64, scratch_operands = 0 : i64, tpu.core_type = #tpu.core_type<tc>, window_params = [{transform_indices = @transform_0, window_bounds = array<i64: 1>}, {transform_indices = @transform_1, window_bounds = array<i64: 1, 8, 128>}, {transform_indices = @transform_2, window_bounds = array<i64: 1, 8, 128>}, {transform_indices = @transform_3, window_bounds = array<i64: 1, 24, 128>}]} {
    %c0_i32 = arith.constant 0 : i32
    %0 = arith.cmpi eq, %arg1, %c0_i32 : i32
    %1 = arith.extui %0 : i1 to i32
    %c0_i32_0 = arith.constant 0 : i32
    %2 = arith.cmpi ne, %1, %c0_i32_0 : i32
    scf.if %2 {
      %cst_31 = arith.constant 0.000000e+00 : f32
      %59 = vector.broadcast %cst_31 : f32 to vector<1x24x128xf32>
      %c0_32 = arith.constant 0 : index
      %c0_33 = arith.constant 0 : index
      %c0_34 = arith.constant 0 : index
      %60 = vector.load %arg5[%c0_32, %c0_33, %c0_34] : memref<1x24x128xf32, #tpu.memory_space<vmem>>, vector<1x24x128xf32>
      tpu.vector_store %arg5[%c0_32, %c0_33, %c0_34], %59 {strides = array<i32>} : memref<1x24x128xf32, #tpu.memory_space<vmem>>, vector<1x24x128xf32>,
    } else {
    }
    %c0 = arith.constant 0 : index
    %3 = memref.load %arg2[%c0] : memref<1xf32, #tpu.memory_space<smem>>
    %c0_1 = arith.constant 0 : index
    %c0_2 = arith.constant 0 : index
    %c0_3 = arith.constant 0 : index
    %4 = vector.load %arg3[%c0_1, %c0_2, %c0_3] : memref<1x8x128xf32, #tpu.memory_space<vmem>>, vector<1x8x128xf32>
    %5 = vector.shape_cast %4 : vector<1x8x128xf32> to vector<8x128xf32>
    %c0_4 = arith.constant 0 : index
    %c0_5 = arith.constant 0 : index
    %c0_6 = arith.constant 0 : index
    %6 = vector.load %arg4[%c0_4, %c0_5, %c0_6] : memref<1x8x128xf32, #tpu.memory_space<vmem>>, vector<1x8x128xf32>
    %7 = vector.shape_cast %6 : vector<1x8x128xf32> to vector<8x128xf32>
    %8 = math.absf %5 : vector<8x128xf32>
    %cst = arith.constant 0.000000e+00 : f32
    %9 = vector.broadcast %cst : f32 to vector<8x128xf32>
    %10 = arith.subf %9, %8 : vector<8x128xf32>
    %11 = math.exp %10 : vector<8x128xf32>
    %cst_7 = arith.constant 0.000000e+00 : f32
    %12 = vector.broadcast %cst_7 : f32 to vector<8x128xf32>
    %13 = arith.maximumf %5, %12 : vector<8x128xf32>
    %cst_8 = arith.constant 1.000000e+00 : f32
    %14 = vector.broadcast %cst_8 : f32 to vector<8x128xf32>
    %15 = arith.addf %14, %11 : vector<8x128xf32>
    %16 = math.log %15 : vector<8x128xf32>
    %17 = arith.addf %13, %16 : vector<8x128xf32>
    %18 = vector.broadcast %3 : f32 to vector<8x128xf32>
    %19 = arith.mulf %18, %7 : vector<8x128xf32>
    %20 = arith.subf %17, %5 : vector<8x128xf32>
    %21 = arith.mulf %19, %20 : vector<8x128xf32>
    %cst_9 = arith.constant 1.000000e+00 : f32
    %22 = vector.broadcast %cst_9 : f32 to vector<8x128xf32>
    %23 = arith.subf %22, %7 : vector<8x128xf32>
    %24 = arith.mulf %23, %17 : vector<8x128xf32>
    %25 = arith.addf %21, %24 : vector<8x128xf32>
    %cst_10 = arith.constant 1.000000e+00 : f32
    %26 = vector.broadcast %cst_10 : f32 to vector<8x128xf32>
    %27 = arith.addf %26, %11 : vector<8x128xf32>
    %28 = tpu.reciprocal %27 : vector<8x128xf32> -> vector<8x128xf32>
    %cst_11 = arith.constant 0.000000e+00 : f32
    %29 = vector.broadcast %cst_11 : f32 to vector<8x128xf32>
    %30 = arith.cmpf oge, %5, %29 : vector<8x128xf32>
    %31 = arith.mulf %11, %28 : vector<8x128xf32>
    %32 = arith.select %30, %28, %31 : vector<8x128xi1>, vector<8x128xf32>
    %33 = arith.mulf %32, %7 : vector<8x128xf32>
    %34 = arith.addf %32, %7 : vector<8x128xf32>
    %c0_12 = arith.constant 0 : index
    %c0_13 = arith.constant 0 : index
    %c0_14 = arith.constant 0 : index
    %35 = vector.load %arg5[%c0_12, %c0_13, %c0_14] : memref<1x24x128xf32, #tpu.memory_space<vmem>>, vector<1x8x128xf32>
    %36 = vector.shape_cast %35 : vector<1x8x128xf32> to vector<8x128xf32>
    %37 = vector.shape_cast %25 : vector<8x128xf32> to vector<1x8x128xf32>
    %cst_15 = arith.constant dense<0.000000e+00> : vector<8x128xf32>
    %38 = vector.multi_reduction <add>, %37, %cst_15 [0] : vector<1x8x128xf32> to vector<8x128xf32>
    %39 = arith.addf %36, %38 : vector<8x128xf32>
    %c0_16 = arith.constant 0 : index
    %c0_17 = arith.constant 0 : index
    %c0_18 = arith.constant 0 : index
    %40 = vector.load %arg5[%c0_16, %c0_17, %c0_18] : memref<1x24x128xf32, #tpu.memory_space<vmem>>, vector<1x8x128xf32>
    %41 = vector.shape_cast %40 : vector<1x8x128xf32> to vector<8x128xf32>
    %42 = vector.shape_cast %39 : vector<8x128xf32> to vector<1x8x128xf32>
    tpu.vector_store %arg5[%c0_16, %c0_17, %c0_18], %42 {strides = array<i32>} : memref<1x24x128xf32, #tpu.memory_space<vmem>>, vector<1x8x128xf32>,
    %c0_19 = arith.constant 0 : index
    %c8 = arith.constant 8 : index
    %c0_20 = arith.constant 0 : index
    %43 = vector.load %arg5[%c0_19, %c8, %c0_20] : memref<1x24x128xf32, #tpu.memory_space<vmem>>, vector<1x8x128xf32>
    %44 = vector.shape_cast %43 : vector<1x8x128xf32> to vector<8x128xf32>
    %45 = vector.shape_cast %33 : vector<8x128xf32> to vector<1x8x128xf32>
    %cst_21 = arith.constant dense<0.000000e+00> : vector<8x128xf32>
    %46 = vector.multi_reduction <add>, %45, %cst_21 [0] : vector<1x8x128xf32> to vector<8x128xf32>
    %47 = arith.addf %44, %46 : vector<8x128xf32>
    %c0_22 = arith.constant 0 : index
    %c8_23 = arith.constant 8 : index
    %c0_24 = arith.constant 0 : index
    %48 = vector.load %arg5[%c0_22, %c8_23, %c0_24] : memref<1x24x128xf32, #tpu.memory_space<vmem>>, vector<1x8x128xf32>
    %49 = vector.shape_cast %48 : vector<1x8x128xf32> to vector<8x128xf32>
    %50 = vector.shape_cast %47 : vector<8x128xf32> to vector<1x8x128xf32>
    tpu.vector_store %arg5[%c0_22, %c8_23, %c0_24], %50 {strides = array<i32>} : memref<1x24x128xf32, #tpu.memory_space<vmem>>, vector<1x8x128xf32>,
    %c0_25 = arith.constant 0 : index
    %c16 = arith.constant 16 : index
    %c0_26 = arith.constant 0 : index
    %51 = vector.load %arg5[%c0_25, %c16, %c0_26] : memref<1x24x128xf32, #tpu.memory_space<vmem>>, vector<1x8x128xf32>
    %52 = vector.shape_cast %51 : vector<1x8x128xf32> to vector<8x128xf32>
    %53 = vector.shape_cast %34 : vector<8x128xf32> to vector<1x8x128xf32>
    %cst_27 = arith.constant dense<0.000000e+00> : vector<8x128xf32>
    %54 = vector.multi_reduction <add>, %53, %cst_27 [0] : vector<1x8x128xf32> to vector<8x128xf32>
    %55 = arith.addf %52, %54 : vector<8x128xf32>
    %c0_28 = arith.constant 0 : index
    %c16_29 = arith.constant 16 : index
    %c0_30 = arith.constant 0 : index
    %56 = vector.load %arg5[%c0_28, %c16_29, %c0_30] : memref<1x24x128xf32, #tpu.memory_space<vmem>>, vector<1x8x128xf32>
    %57 = vector.shape_cast %56 : vector<1x8x128xf32> to vector<8x128xf32>
    %58 = vector.shape_cast %55 : vector<8x128xf32> to vector<1x8x128xf32>
    tpu.vector_store %arg5[%c0_28, %c16_29, %c0_30], %58 {strides = array<i32>} : memref<1x24x128xf32, #tpu.memory_space<vmem>>, vector<1x8x128xf32>,
    return
  }
  func.func @transform_0(%arg0: i32, %arg1: i32) -> i32 {
    %c0_i32 = arith.constant 0 : i32
    %c0_i32_0 = arith.constant 0 : i32
    return %c0_i32 : i32
  }
  func.func @transform_1(%arg0: i32, %arg1: i32) -> (i32, i32, i32) {
    %c0_i32 = arith.constant 0 : i32
    %c0_i32_0 = arith.constant 0 : i32
    return %arg0, %arg1, %c0_i32 : i32, i32, i32
  }
  func.func @transform_2(%arg0: i32, %arg1: i32) -> (i32, i32, i32) {
    %c0_i32 = arith.constant 0 : i32
    %c0_i32_0 = arith.constant 0 : i32
    return %arg0, %arg1, %c0_i32 : i32, i32, i32
  }
  func.func @transform_3(%arg0: i32, %arg1: i32) -> (i32, i32, i32) {
    %c0_i32 = arith.constant 0 : i32
    %c0_i32_0 = arith.constant 0 : i32
    %c0_i32_1 = arith.constant 0 : i32
    return %arg0, %c0_i32, %c0_i32_0 : i32, i32, i32
  }
}

</mosaic_0001>

<bundles_post_ra>
// kernel: classification_loss.1
= control target key start
LH: loop header
LB: loop body
LE: loop exit
PB: predicated region body
PF: predicated region fallthrough
CT: control target
= control target key end

     0   :  { %s447_s14 = smov 0   ;;  %s449_s15 = smov 0   ;;  %s487_s0 = inlined_call_operand.<no memory space> [shape: f32[1], index: 0, kind: input, shape index: {}]   ;;  %s488_s1 = inlined_call_operand.vmem [shape: f32[2,8,128], index: 1, kind: input, shape index: {}]   ;;  %s489_s2 = inlined_call_operand.vmem [shape: f32[2,8,128], index: 2, kind: input, shape index: {}]   ;;  %s490_s3 = inlined_call_operand.vmem [shape: f32[2,24,128], index: 3, kind: output, shape index: {}]  }
   0x1   :  { %8 = sst [smem:[#allocation2]] %s487_s0  ;;  %s451_s16 = smov 0  }
   0x2 LB: > { %s26_s0 = sadd.s32 1, %s418_s15  ;;  %p362_p0 = scmp.ge.s32.totalorder %s422_s16, 1  ;;  %s422_s16 = sphi %s451_s16, %s14_s16   ;;  %s418_s15 = sphi %s449_s15, %s492_s15   ;;  %s414_s14 = sphi %s447_s14, %s491_s14  }
   0x3   : > { %p28_p1 = scmp.ge.s32.totalorder %s26_s0, 2  ;;  %p168_p2 = scmp.lt.s32.totalorder %s422_s16, 3 }
   0x5   : > { %s494_s0 = smov (%p28_p1, %s26_s0), 0  ;;  %p169_p3 = pnand %p362_p0, %p168_p2 }
   0x6   : > { %p201_p4 = scmp.lt.s32.totalorder (!%p169_p3), %s414_s14, 1  ;;  %s227_s21 = sld [smem:[#allocation2]] (!%p169_p3) }
   0x7   : > { %172 = sbr.rel (%p169_p3) target bundleno = 56 (0x38), region = 32 }
   0xc   : > { %s496_s14 = smov (!%p201_p4, %s414_s14), 1  ;;  %v239_v9 = vstv %s227_s21 }
   0xd   : > { %s363_s17 = sshll.u32 %s496_s14, 3  ;;  %s368_s25 = smul.u32 24, %s496_s14 }
   0xe   : > { %s207_s20 = scalar_lea.vmem %s488_s1, %s363_s17  ;;  %s214_s24 = scalar_lea.vmem %s489_s2, %s363_s17 }
   0xf   : > { %v228_v0 = vld [vmem:[%s207_s20] sm:$0xff]  ;;  %s219_s28 = scalar_lea.vmem %s490_s3, %s368_s25 }
  0x10   : > { %v230_v1 = vand.u32 2147483647, %v228_v0  ;;  %v229_v6 = vld [vmem:[%s214_s24] sm:$0xff]  ;;  %v234_v7 = vmax.f32 %v228_v0, 0.0  ;;  %vm260_vm4 = vcmp.ge.f32.partialorder %v228_v0, 0.0 }
  0x11   : > { %v243_v12 = vsub.f32 1.0, %v229_v6  ;;  %v240_v15 = vmul.f32 %v239_v9, %v229_v6 }
  0x12   : > { %v231_v2 = vsub.f32 0.0, %v230_v1 }
  0x14   : > { %v232_v3 = vmul.f32 1.442695, %v231_v2 }
  0x16   : > { %394 = vpow2.f32 %v232_v3 }
  0x1c   : > { %v395_v4 = vpop.eup %394 }
  0x1d   : > { %v235_v5 = vadd.f32 1.0, %v395_v4 }
  0x1f   : > { %396 = vlog2.f32 %v235_v5  ;;  %v257_v16 = vand.u32 2147483648, %v235_v5  ;;  %vm251_vm0 = vweird.f32 %v235_v5  ;;  %v255_v18 = vand.u32 2147483647, %v235_v5 }
  0x20   : > { %398 = vrcp.f32 %v235_v5 }
  0x21   : > { %v258_v23 = vor.u32 1.1754944e-38, %v257_v16  ;;  %vm256_vm3 = vcmp.eq.f32.partialorder %v255_v18, 8.507059e+37 }
  0x25   : > { %v397_v8 = vpop.eup %396 }
  0x26   : > { %v399_v10 = vpop.eup %398  ;;  %v237_v11 = vmul.f32 0.6931472, %v397_v8 }
  0x27   : > { %v247_v13 = vmul.f32 %v399_v10, %v235_v5  ;;  %vm252_vm1 = vweird.f32 %v399_v10 }
  0x28   : > { %v238_v14 = vadd.f32 %v237_v11, %v234_v7  ;;  %vm253_vm2 = vmor %vm251_vm0, %vm252_vm1 }
  0x29   : > { %v248_v17 = vsub.f32 1.0, %v247_v13 }
  0x2a   : > { %v241_v19 = vsub.f32 %v238_v14, %v228_v0  ;;  %v244_v20 = vmul.f32 %v243_v12, %v238_v14 }
  0x2b   : > { %v249_v21 = vmul.f32 %v399_v10, %v248_v17 }
  0x2c   : > { %v242_v22 = vmul.f32 %v241_v19, %v240_v15 }
  0x2d   : > { %v250_v24 = vadd.f32 %v399_v10, %v249_v21 }
  0x2e   : > { %v245_v25 = vadd.f32 %v244_v20, %v242_v22 }
  0x2f   : > { %v254_v26 = vsel %vm253_vm2, %v399_v10, %v250_v24 }
  0x30   : > { %v259_v27 = vsel %vm256_vm3, %v258_v23, %v254_v26  ;;  %268 = vst [vmem:[%s219_s28] sm:$0xff] %v245_v25 }
  0x31   : > { %v261_v28 = vmul.f32 %v395_v4, %v259_v27 }
  0x33   : > { %v262_v29 = vsel %vm260_vm4, %v259_v27, %v261_v28 }
  0x34   : > { %v263_v30 = vmul.f32 %v262_v29, %v229_v6  ;;  %v264_v31 = vadd.f32 %v262_v29, %v229_v6 }
  0x36   : > { %272 = vst [vmem:[%s219_s28 + $0x8] sm:$0xff] %v263_v30 }
  0x37   : > { %276 = vst [vmem:[%s219_s28 + $0x10] sm:$0xff] %v264_v31 }
  0x38 PF: > { %s14_s16 = sadd.s32 1, %s422_s16   ;;  %s491_s14 = smov %s418_s15 }
  0x39   : > { %p11_p5 = scmp.ge.s32.totalorder %s14_s16, 4   ;;  %s492_s15 = smov %s494_s0 }
  0x3b   :  { %13 = sbr.rel (!%p11_p5) target bundleno = 2 (0x2), region = 69 }

</bundles_post_ra>
